<compile_context>
chip_gen: v7x
topology: tpu7x:2x2x1
jax: 0.10.0
libtpu: 0.0.40
codegen_flags: <defaults>
</compile_context>

<pallas_src>
from functools import partial

import numpy as np
import jax
import jax.numpy as jnp
from jax.experimental import pallas as pl
from jax.experimental.pallas import tpu as pltpu


# Raise the scoped-VMEM limit (v5e default is only 16 MiB) while leaving headroom
# under v7x's 64 MiB physical VMEM.  Tiles are sized against _TILE_VMEM_BUDGET.
_VMEM_LIMIT_BYTES = 48 * 1024 * 1024
_TILE_VMEM_BUDGET = 28 * 1024 * 1024


def _round_up(x, m):
    return ((x + m - 1) // m) * m


def _pick_tm(n, c, t_pad):
    """Row tile from a VMEM byte budget (multiple of 8, capped at 2048 / problem size)."""
    # grid-invariant one-hot, double-buffered bf16
    fixed = 2 * c * t_pad * 2
    # per row: dbl-buffered logits (<=f32) + ~3 f32 softmax temps + dbl-buffered
    # f32 cost tile + lse
    per_row = 5 * c * 4 + 2 * t_pad * 4 + 8
    avail = max(_TILE_VMEM_BUDGET - fixed, 1 << 20)
    tm = min(int(avail // per_row), 2048, _round_up(n, 8))
    return max(8, (tm // 8) * 8)


# ----------------------------- Pallas kernel --------------------------------

def _cost_lse_kernel(logits_ref, onehot_t_ref, cost_ref, lse_ref, *, neg_cost_class):
    # cost[i, t] = -cost_class * softmax(logits)[i, tgt_ids[t]]  via MXU matmul
    # lse[i]     = logsumexp(logits[i, :])                        (exact, f32)
    x = logits_ref[...].astype(jnp.float32)
    m = jnp.max(x, axis=-1, keepdims=True)
    e = jnp.exp(x - m)
    s = jnp.sum(e, axis=-1, keepdims=True)
    # fold -cost_class into the (tm, 1) reciprocal -> no full-tile post-matmul scale
    scale = pl.reciprocal(s, approx=True) * neg_cost_class
    p = (e * scale).astype(jnp.bfloat16)
    cost_ref[...] = jnp.dot(p, onehot_t_ref[...], preferred_element_type=jnp.float32)
    lse_ref[...] = m + jnp.log(s)


# ------------------------------ jitted wrappers ------------------------------

@partial(jax.jit, static_argnames=("cost_class", "tm"))
def _cost_and_lse(logits, tgt_ids_p, *, cost_class, tm):
    """logits: (n, c) original (unpadded). tgt_ids_p: (t_pad,) int32, -1 = padding."""
    n, c = logits.shape
    t_pad = tgt_ids_p.shape[0]

    # transposed one-hot (c, t_pad) in bf16 (exact 0/1); padded ids (-1) -> zero cols
    onehot_t = (jnp.arange(c, dtype=jnp.int32)[:, None] == tgt_ids_p[None, :]
                ).astype(jnp.bfloat16)

    grid = (pl.cdiv(n, tm),)
    cost, lse = pl.pallas_call(
        partial(_cost_lse_kernel, neg_cost_class=-float(cost_class)),
        out_shape=(jax.ShapeDtypeStruct((n, t_pad), jnp.float32),
                   jax.ShapeDtypeStruct((n, 1), jnp.float32)),
        grid=grid,
        in_specs=(
            # last dim == full array dim -> no class padding / no logits copy
            pl.BlockSpec((tm, c), lambda i: (i, 0)),
            # grid-invariant operand, stays resident in VMEM
            pl.BlockSpec((c, t_pad), lambda i: (0, 0)),
        ),
        out_specs=(pl.BlockSpec((tm, t_pad), lambda i: (i, 0)),
                   pl.BlockSpec((tm, 1), lambda i: (i, 0))),
        compiler_params=pltpu.CompilerParams(
            dimension_semantics=("parallel",),
            vmem_limit_bytes=_VMEM_LIMIT_BYTES),
    )(logits, onehot_t)
    return cost, lse


@jax.jit
def _ce_from_lse(logits, lse, labels):
    # mean_i( lse_i - logits[i, y_i] ) == F.cross_entropy(logits, y)
    # Tiny gather (n scalars) in XLA -- avoids re-streaming the full logits array.
    picked = jnp.take_along_axis(logits, labels[:, None], axis=1).astype(jnp.float32)
    return jnp.mean(lse - picked)


# --------------------- host-side Hungarian (scipy-equivalent) ---------------

def linear_sum_assignment_np(cost):
    """Rectangular min-cost assignment, equivalent to scipy.optimize.linear_sum_assignment."""
    cost = np.asarray(cost, dtype=np.float64)
    nr, nc = cost.shape
    n = max(nr, nc)
    sq = np.zeros((n, n), dtype=np.float64)
    sq[:nr, :nc] = cost
    INF = 1e18
    u = np.zeros(n + 1)
    v = np.zeros(n + 1)
    p = np.zeros(n + 1, dtype=np.int64)    # p[j] = row matched to col j (1-indexed)
    way = np.zeros(n + 1, dtype=np.int64)
    for i in range(1, n + 1):
        p[0] = i
        j0 = 0
        minv = np.full(n + 1, INF)
        used = np.zeros(n + 1, dtype=bool)
        while True:
            used[j0] = True
            i0 = p[j0]
            delta = INF
            j1 = 0
            for j in range(1, n + 1):
                if not used[j]:
                    cur = sq[i0 - 1, j - 1] - u[i0] - v[j]
                    if cur < minv[j]:
                        minv[j] = cur
                        way[j] = j0
                    if minv[j] < delta:
                        delta = minv[j]
                        j1 = j
            for j in range(n + 1):
                if used[j]:
                    u[p[j]] += delta
                    v[j] -= delta
                else:
                    minv[j] -= delta
            j0 = j1
            if p[j0] == 0:
                break
        while True:
            j1 = way[j0]
            p[j0] = p[j1]
            j0 = j1
            if j0 == 0:
                break
    rows, cols = [], []
    for j in range(1, n + 1):
        r, c = p[j] - 1, j - 1
        if r < nr and c < nc:
            rows.append(r)
            cols.append(c)
    order = np.argsort(rows)
    return (np.asarray(rows, dtype=np.int64)[order],
            np.asarray(cols, dtype=np.int64)[order])


# ------------------------------- forward ------------------------------------

def hungarian_loss(outputs, vg_obj_cls, cost_class=1.0):
    """outputs: (bs, num_queries, num_classes) logits; vg_obj_cls: (bs, max_targets) int."""
    bs, nq, ncls = outputs.shape
    n = bs * nq
    logits = outputs.reshape(n, ncls)

    # Host-side target bookkeeping (tiny; the reference also syncs here via .tolist()).
    cls_np = np.asarray(vg_obj_cls)
    mask = cls_np != 0
    sizes = mask.sum(-1)
    tgt_ids = cls_np[mask].astype(np.int32)            # valid targets only
    t_valid = int(tgt_ids.shape[0])
    offsets = np.concatenate([[0], np.cumsum(sizes)])

    # Pad target ids to a 128-lane bucket (shape-stable jit); -1 -> all-zero one-hot col.
    t_pad = _round_up(max(t_valid, 1), 128)
    tgt_ids_p = np.full((t_pad,), -1, np.int32)
    tgt_ids_p[:t_valid] = tgt_ids

    tm = _pick_tm(n, ncls, t_pad)

    # device pass: fused softmax + class-cost matmul + logsumexp (one dispatch)
    cost_dev, lse_dev = _cost_and_lse(
        logits, jnp.asarray(tgt_ids_p), cost_class=float(cost_class), tm=tm)

    # Single D2H sync for the Hungarian solve; drop padded lanes on device first.
    tgt_queries = np.zeros((bs, nq), dtype=np.int32)
    if t_valid > 0:
        cost_np = np.asarray(cost_dev[:, :t_valid])
        Cmat = cost_np.reshape(bs, nq, t_valid)
        for b in range(bs):
            s0, e0 = int(offsets[b]), int(offsets[b + 1])
            if e0 > s0:
                # Matches the reference: tgt_queries stores the matched column index
                # within the per-batch valid-target slice; CE uses those as labels.
                row_ind, col_ind = linear_sum_assignment_np(Cmat[b, :, s0:e0])
                tgt_queries[b, row_ind] = col_ind

    # Cross-entropy reusing the exact f32 lse from the kernel (no second logits stream).
    labels = jnp.asarray(tgt_queries.reshape(-1), dtype=jnp.int32)
    loss = _ce_from_lse(logits, lse_dev, labels)
    return loss, tgt_queries


# ------------------------------- reference -----------------------------------

def _np_cross_entropy(logits, y):
    x = np.asarray(logits, dtype=np.float64)
    m = x.max(-1, keepdims=True)
    lse = m[:, 0] + np.log(np.exp(x - m).sum(-1))
    picked = x[np.arange(x.shape[0]), y]
    return (lse - picked).mean()


if __name__ == "__main__":
    bs, nq, ncls, max_t = 2, 8, 32, 6
    key = jax.random.PRNGKey(0)
    k1, k2 = jax.random.split(key)
    outputs = jax.random.normal(k1, (bs, nq, ncls), dtype=jnp.float32)
    vg_obj_cls = jax.random.randint(k2, (bs, max_t), 0, ncls)
    # guarantee at least one valid (nonzero-class) target per batch
    vg_obj_cls = vg_obj_cls.at[:, 0].set(jnp.array([3, 7], dtype=vg_obj_cls.dtype))

    loss, tgt_queries = hungarian_loss(outputs, vg_obj_cls, cost_class=1.0)
    loss = jax.block_until_ready(loss)

    # sanity check of the CE hot path (kernel lse + XLA gather) vs numpy reference
    ref = _np_cross_entropy(np.asarray(outputs).reshape(bs * nq, ncls),
                            tgt_queries.reshape(-1))
    assert np.isfinite(float(loss))
    assert np.allclose(float(loss), ref, rtol=1e-4, atol=1e-4), (float(loss), ref)

    print("KERNEL_OK")
</pallas_src>

<mosaic_0001>
module attributes {stable_mosaic.version = 11 : i64} {
  func.func @_cost_lse_kernel(%arg0: i32, %arg1: memref<16x32xf32, #tpu.memory_space<vmem>>, %arg2: memref<32x128xbf16, #tpu.memory_space<vmem>>, %arg3: memref<16x128xf32, #tpu.memory_space<vmem>>, %arg4: memref<16x1xf32, #tpu.memory_space<vmem>>) attributes {dimension_semantics = [#tpu.dimension_semantics<parallel>], iteration_bounds = array<i64: 1>, scalar_prefetch = 0 : i64, scratch_operands = 0 : i64, tpu.core_type = #tpu.core_type<tc>, window_params = [{transform_indices = @transform_0, window_bounds = array<i64: 16, 32>}, {pipeline_mode = #tpu.pipeline_mode<synchronous>, transform_indices = @transform_1, window_bounds = array<i64: 32, 128>}, {transform_indices = @transform_2, window_bounds = array<i64: 16, 128>}, {transform_indices = @transform_3, window_bounds = array<i64: 16, 1>}]} {
    %c0 = arith.constant 0 : index
    %c0_0 = arith.constant 0 : index
    %0 = vector.load %arg1[%c0, %c0_0] : memref<16x32xf32, #tpu.memory_space<vmem>>, vector<16x32xf32>
    %cst = arith.constant dense<0xFF800000> : vector<16xf32>
    %1 = vector.multi_reduction <maximumf>, %0, %cst [1] : vector<16x32xf32> to vector<16xf32>
    %2 = vector.shape_cast %1 : vector<16xf32> to vector<16x1xf32>
    %3 = vector.broadcast %2 : vector<16x1xf32> to vector<16x32xf32>
    %4 = arith.subf %0, %3 : vector<16x32xf32>
    %5 = math.exp %4 : vector<16x32xf32>
    %cst_1 = arith.constant dense<0.000000e+00> : vector<16xf32>
    %6 = vector.multi_reduction <add>, %5, %cst_1 [1] : vector<16x32xf32> to vector<16xf32>
    %7 = vector.shape_cast %6 : vector<16xf32> to vector<16x1xf32>
    %8 = tpu.reciprocal %7 {approx = true} : vector<16x1xf32> -> vector<16x1xf32>
    %cst_2 = arith.constant -1.000000e+00 : f32
    %9 = vector.broadcast %cst_2 : f32 to vector<16x1xf32>
    %10 = arith.mulf %8, %9 : vector<16x1xf32>
    %11 = vector.broadcast %10 : vector<16x1xf32> to vector<16x32xf32>
    %12 = arith.mulf %5, %11 : vector<16x32xf32>
    %13 = arith.truncf %12 : vector<16x32xf32> to vector<16x32xbf16>
    %c0_3 = arith.constant 0 : index
    %c0_4 = arith.constant 0 : index
    %14 = vector.load %arg2[%c0_3, %c0_4] : memref<32x128xbf16, #tpu.memory_space<vmem>>, vector<32x128xbf16>
    %cst_5 = arith.constant dense<0.000000e+00> : vector<16x128xf32>
    %15 = tpu.matmul %13, %14, %cst_5 {dimension_numbers = #tpu.dot_dimension_numbers<[1], [0], [0], [1], [0, 0, 1, 1], [], []>} : vector<16x32xbf16>, vector<32x128xbf16>, vector<16x128xf32> -> vector<16x128xf32>
    %c0_6 = arith.constant 0 : index
    %c0_7 = arith.constant 0 : index
    %16 = vector.load %arg3[%c0_6, %c0_7] : memref<16x128xf32, #tpu.memory_space<vmem>>, vector<16x128xf32>
    tpu.vector_store %arg3[%c0_6, %c0_7], %15 {strides = array<i32>} : memref<16x128xf32, #tpu.memory_space<vmem>>, vector<16x128xf32>,
    %17 = math.log %7 : vector<16x1xf32>
    %18 = arith.addf %2, %17 : vector<16x1xf32>
    %c0_8 = arith.constant 0 : index
    %c0_9 = arith.constant 0 : index
    %19 = vector.load %arg4[%c0_8, %c0_9] : memref<16x1xf32, #tpu.memory_space<vmem>>, vector<16x1xf32>
    tpu.vector_store %arg4[%c0_8, %c0_9], %18 {strides = array<i32>} : memref<16x1xf32, #tpu.memory_space<vmem>>, vector<16x1xf32>,
    return
  }
  func.func @transform_0(%arg0: i32) -> (i32, i32) {
    %c0_i32 = arith.constant 0 : i32
    %c0_i32_0 = arith.constant 0 : i32
    return %arg0, %c0_i32 : i32, i32
  }
  func.func @transform_1(%arg0: i32) -> (i32, i32) {
    %c0_i32 = arith.constant 0 : i32
    %c0_i32_0 = arith.constant 0 : i32
    %c0_i32_1 = arith.constant 0 : i32
    return %c0_i32, %c0_i32_0 : i32, i32
  }
  func.func @transform_2(%arg0: i32) -> (i32, i32) {
    %c0_i32 = arith.constant 0 : i32
    %c0_i32_0 = arith.constant 0 : i32
    return %arg0, %c0_i32 : i32, i32
  }
  func.func @transform_3(%arg0: i32) -> (i32, i32) {
    %c0_i32 = arith.constant 0 : i32
    %c0_i32_0 = arith.constant 0 : i32
    return %arg0, %c0_i32 : i32, i32
  }
}

</mosaic_0001>

<bundles_post_ra>
// kernel: _cost_and_lse.1
= control target key start
LH: loop header
LB: loop body
LE: loop exit
PB: predicated region body
PF: predicated region fallthrough
CT: control target
= control target key end

     0   :  { %vm17_vm0 = vcmask 261120   ;;  %s251_s0 = inlined_call_operand.vmem [shape: f32[16,32], index: 0, kind: input, shape index: {}]   ;;  %s252_s1 = inlined_call_operand.vmem [shape: bf16[32,128], index: 1, kind: input, shape index: {}]   ;;  %s253_s2 = inlined_call_operand.hbm [shape: f32[16,128], index: 2, kind: output, shape index: {0}]   ;;  %s254_s3 = inlined_call_operand.vmem [shape: f32[16,1], index: 3, kind: output, shape index: {1}]  }
   0x1   :  { %v15_v0 = vld [vmem:[%s251_s0] sm:$0xff]  ;;  %v16_v1 = vld [vmem:[%s251_s0 + $0x8] sm:$0xff] }
   0x2   :  { %v18_v2 = vsel %vm17_vm0, %v15_v0, -inf }
   0x3   :  { %19 = vmax.xlane.f32.xlu0 %v18_v2 }
   0x4   :  { %9 = vsyncpa [#allocation3], 0  ;;  %v21_v3 = vsel %vm17_vm0, %v16_v1, -inf  ;;  %v153_v14 = vld [vmem:[%s252_s1] sm:$0xff]   ;;  %v191_v15 = vmov 0.0   ;;  %v154_v16 = vld [vmem:[%s252_s1 + $0x8] sm:$0xff]  }
   0x5   :  { %140 = vmatprep.subr.bf16.mxu0 %v191_v15  ;;  %vm192_vm1 = vmmov 0   ;;  %vm111_vm2 = vcmask 7168   ;;  %s193_s22 = smov [#allocation2]  }
   0x6   :  { %141 = vmatpush3.bf16.msra.mxu0 %v153_v14  ;;  %144 = vmatprep.mubr.msk.bf16.mxu0 %vm192_vm1, %v191_v15  ;;  %s119_s23 = sshll.u32 %s193_s22, 4  ;;  %s120_s23 = int_to_ptr.vmem [resolvable:$true] %s119_s23 }
   0x7   :  { %22 = vmax.xlane.f32.xlu0 %v21_v3  ;;  %142 = vmatprep.subr.bf16.mxu0 %v191_v15  ;;  %s167_s24 = scalar_lea.vmem %s120_s23, 256  ;;  %p172_p1 = scmp.lt.s32.totalorder %s120_s23, %s120_s23 }
   0x8   :  { %p168_p0 = scmp.ne.s32.totalorder %s120_s23, %s167_s24  ;;  %p173_p2 = scmp.lt.s32.totalorder %s167_s24, %s167_s24 }
   0xa   :  { %143 = vmatpush3.bf16.msra.mxu0 %v154_v16  ;;  %p174_p3 = por %p173_p2, %p172_p1 }
   0xc   :  { %p175_p4 = pnand %p174_p3, %p168_p0 }
  0x90   :  { %v20_v4 = vpop.xlane.xlu0 %19 }
  0x91   :  { %v24_v5 = vsub.f32 %v15_v0, %v20_v4 }
  0x93   :  { %v26_v6 = vmul.f32 1.442695, %v24_v5 }
  0x94   :  { %v23_v7 = vpop.xlane.xlu0 %22 }
  0x95   :  { %155 = vpow2.f32 %v26_v6  ;;  %v25_v8 = vsub.f32 %v16_v1, %v23_v7 }
  0x97   :  { %v28_v9 = vmul.f32 1.442695, %v25_v8 }
  0x99   :  { %157 = vpow2.f32 %v28_v9 }
  0x9f   :  { %v156_v10 = vpop.eup %155 }
  0xa0   :  { %v30_v11 = vsel %vm17_vm0, %v156_v10, 0.0 }
  0xa1   :  { %31 = vadd.xlane.f32.xlu1 %v30_v11 }
  0xa3   :  { %v158_v12 = vpop.eup %157 }
  0xa4   :  { %v33_v13 = vsel %vm17_vm0, %v158_v12, 0.0 }
  0xa5   :  { %34 = vadd.xlane.f32.xlu1 %v33_v13 }
 0x12e   :  { %v32_v17 = vpop.xlane.xlu1 %31 }
 0x12f   :  { %159 = vrcp.f32 %v32_v17 }
 0x130   :  { %161 = vlog2.f32 %v32_v17 }
 0x132   :  { %v35_v18 = vpop.xlane.xlu1 %34 }
 0x133   :  { %163 = vrcp.f32 %v35_v18 }
 0x134   :  { %165 = vlog2.f32 %v35_v18 }
 0x139   :  { %v160_v19 = vpop.eup %159 }
 0x13a   :  { %v162_v20 = vpop.eup %161  ;;  %v38_v22 = vmul.f32 -1.0, %v160_v19 }
 0x13b   :  { %v106_v21 = vmul.f32 0.6931472, %v162_v20 }
 0x13c   :  { %v40_v28 = vmul.f32 %v156_v10, %v38_v22 }
 0x13d   :  { %v164_v23 = vpop.eup %163  ;;  %v109_v24 = vadd.f32 %v106_v21, %v20_v4 }
 0x13e   :  { %v166_v25 = vpop.eup %165  ;;  %v39_v26 = vmul.f32 -1.0, %v164_v23 }
 0x13f   :  { %112 = vst.msk [vmem:[%s254_s3] sm:$0xff] %vm111_vm2, %v109_v24  ;;  %v108_v27 = vmul.f32 0.6931472, %v166_v25 }
 0x140   :  { %v41_v29 = vmul.f32 %v158_v12, %v39_v26 }
 0x141   :  { %v110_v30 = vadd.f32 %v108_v27, %v23_v7 }
 0x142   :  { %v42_v31 = vpack.c.bf16 %v41_v29, %v40_v28 }
 0x143   :  { %113 = vst.msk [vmem:[%s254_s3 + $0x8] sm:$0xff] %vm111_vm2, %v110_v30 }
 0x144   :  { %145 = vmatmul.mubr.msk.bf16.vlgmr.msra.gmra.mrb[0].mxu0 %vm17_vm0, %v42_v31 }
 0x217   :  { %v96_v32 = vpop.f32.mrb[0].mxu0 }
 0x218   :  { %103 = vst [vmem:[#allocation2] sm:$0xff] %v96_v32  ;;  %v146_v33 = vpop.f32.mrb[1].mxu0 }
 0x219   :  { %v99_v34 = vpop.f32.mrb[2].mxu0 }
 0x21a   :  { %104 = vst [vmem:[#allocation2 + $0x8] sm:$0xff] %v99_v34  ;;  %v147_v35 = vpop.f32.mrb[3].mxu0 }
 0x21b   :  { %178 = shalt.err (!%p175_p4)
}
 0x21c   :  { %s179_s26 = scalar_lea.hbm %s253_s2, 256 }
 0x21d   :  { %p180_p5 = scmp.ne.s32.totalorder %s253_s2, %s179_s26  ;;  %p183_p6 = scmp.lt.u32.totalorder %s179_s26, %s253_s2 }
 0x21f   :  { %p185_p7 = pnand %p183_p6, %p180_p5 }
 0x221   :  { %188 = shalt.err (!%p185_p7)
}
 0x222   :  { %s194_s4 = smov 128   ;;  %s195_s5 = smov 8  }
 0x223   :  { %125 = dma.vmem_to_hbm [thread:$0]  %s120_s23, 256, %s253_s2, [#allocation3], %s194_s4, %s194_s4, %s195_s5  }
 0x224   :  { %189 = dma.done.wait [#allocation3], 256  }
 0x225   :  { %190 = vsyncadd [#allocation3], 4294967040 }
 0x226   :  { %133 = vsyncpa [#allocation3], 1 }

</bundles_post_ra>
